<compile_context>
chip_gen: v6e
topology: v6e:2x2x1
jax: 0.10.0
libtpu: 0.0.40
codegen_flags: <defaults>
</compile_context>

<pallas_src>
import jax
import jax.numpy as jnp
from jax.experimental import pallas as pl
from jax.experimental.pallas import tpu as pltpu

# FizzBuzz constants (classic fizzbuzz-NN sizes)
NUM_DIGITS = 10       # binary-encoded input width
NUMS_NEURONS = 64     # hidden width
NUMBER_OF_KEYS = 4    # {number, fizz, buzz, fizzbuzz}


def _round_up(n, m):
    return ((n + m - 1) // m) * m


def _mlp_kernel(x_ref, w1_ref, b1_ref, w2_ref, b2_ref, o_ref):
    # Hot path: two MXU matmuls + VPU bias-add / ReLU, all in VMEM.
    # x / w1 / w2 may be bf16 (cast in the wrapper so the HBM DMA is bf16);
    # accumulation, bias-add and ReLU are always f32.
    h = jnp.dot(x_ref[...], w1_ref[...], preferred_element_type=jnp.float32)
    h = jnp.maximum(h + b1_ref[...], 0.0)               # f32 bias + ReLU (VPU)
    h = h.astype(w2_ref.dtype)                          # bf16 for the 2nd MXU pass
    out = jnp.dot(h, w2_ref[...], preferred_element_type=jnp.float32) + b2_ref[...]
    o_ref[...] = out.astype(o_ref.dtype)                # (TB, 4) store, unpadded


def fizzbuzz_forward(x, w1, b1, w2, b2, *, block_b=4096, use_bf16=True):
    """x: (B, NUM_DIGITS) -> (B, NUMBER_OF_KEYS).

    use_bf16=True (default, large-batch path): x/w1/w2 are cast to bf16 in the
    wrapper (halving the dominant HBM traffic) and logits are written as bf16;
    accumulation stays f32.  use_bf16=False gives a bit-tight f32 path.
    """
    B, d_in = x.shape
    d_hidden = w1.shape[1]
    d_out = w2.shape[1]

    # --- dtype of the HBM-touching arrays ------------------------------------
    if use_bf16:
        x = x.astype(jnp.bfloat16)
        w1 = w1.astype(jnp.bfloat16)
        w2 = w2.astype(jnp.bfloat16)
        out_dtype = jnp.bfloat16
    else:
        out_dtype = jnp.float32
    # biases stay f32 (tiny, resident in VMEM), bias-add is f32 on the VPU.
    b1 = b1.astype(jnp.float32)
    b2 = b2.astype(jnp.float32)

    # --- batch tiling ---------------------------------------------------------
    block_b = max(8, _round_up(block_b, 8))       # (8,128) rule: sublane dim % 8
    B8 = _round_up(B, 8)
    TB = min(block_b, B8)
    # Prefer >= 2 grid steps so v7x's two TensorCores both get work (only when
    # it keeps TB a multiple of 8 that exactly divides the batch).
    if TB == B8 and B8 >= 16 and (B8 // 2) % 8 == 0:
        TB = B8 // 2
    B_pad = _round_up(B, TB)
    xp = jnp.pad(x, ((0, B_pad - B), (0, 0))) if B_pad != B else x
    grid = (B_pad // TB,)

    # --- cost estimate (real, unpadded traffic) -------------------------------
    flops = 2 * B_pad * (d_in * d_hidden + d_hidden * d_out)
    bytes_accessed = (
        B_pad * d_in * xp.dtype.itemsize                    # x
        + (d_in * d_hidden + d_hidden * d_out) * w1.dtype.itemsize  # w1, w2
        + (d_hidden + d_out) * 4                            # b1, b2 (f32)
        + B_pad * d_out * jnp.dtype(out_dtype).itemsize     # logits
    )

    out = pl.pallas_call(
        _mlp_kernel,
        out_shape=jax.ShapeDtypeStruct((B_pad, d_out), out_dtype),
        grid=grid,
        in_specs=[
            pl.BlockSpec((TB, d_in), lambda i: (i, 0)),            # x tile
            pl.BlockSpec((d_in, d_hidden), lambda i: (0, 0)),      # w1 (resident)
            pl.BlockSpec((1, d_hidden), lambda i: (0, 0)),         # b1 (resident)
            pl.BlockSpec((d_hidden, d_out), lambda i: (0, 0)),     # w2 (resident)
            pl.BlockSpec((1, d_out), lambda i: (0, 0)),            # b2 (resident)
        ],
        out_specs=pl.BlockSpec((TB, d_out), lambda i: (i, 0)),     # unpadded logits
        compiler_params=pltpu.CompilerParams(
            dimension_semantics=("parallel",),   # shard batch across v7x's 2 TCs
            vmem_limit_bytes=32 * 1024 * 1024,   # double-buffered lane-padded x at
                                                 # TB=4096 overflows v5e's 16 MiB default
        ),
        cost_estimate=pl.CostEstimate(
            flops=flops, transcendentals=0, bytes_accessed=bytes_accessed
        ),
    )(xp, w1, b1, w2, b2)

    # no-op when TB divides B (the common case); real slice only if we padded.
    return out[:B] if B_pad != B else out


def init_params(key):
    """Deterministic init mimicking PyTorch nn.Linear default (U[-1/sqrt(fan_in), 1/sqrt(fan_in)])."""
    k1, k2, k3, k4 = jax.random.split(key, 4)
    bound1 = 1.0 / jnp.sqrt(NUM_DIGITS)
    bound2 = 1.0 / jnp.sqrt(NUMS_NEURONS)
    w1 = jax.random.uniform(k1, (NUM_DIGITS, NUMS_NEURONS), jnp.float32, -bound1, bound1)
    b1 = jax.random.uniform(k2, (1, NUMS_NEURONS), jnp.float32, -bound1, bound1)
    w2 = jax.random.uniform(k3, (NUMS_NEURONS, NUMBER_OF_KEYS), jnp.float32, -bound2, bound2)
    b2 = jax.random.uniform(k4, (1, NUMBER_OF_KEYS), jnp.float32, -bound2, bound2)
    return w1, b1, w2, b2


if __name__ == "__main__":
    key = jax.random.PRNGKey(0)
    kx, kp = jax.random.split(key)

    batch = 8
    # binary-encoded integers as float inputs, like the classic fizzbuzz net
    x = jax.random.bernoulli(kx, 0.5, (batch, NUM_DIGITS)).astype(jnp.float32)

    w1, b1, w2, b2 = init_params(kp)

    # plain-JAX reference
    ref = jnp.maximum(x @ w1 + b1, 0.0) @ w2 + b2

    # bit-exact f32 path
    out_f32 = jax.block_until_ready(fizzbuzz_forward(x, w1, b1, w2, b2, use_bf16=False))
    assert out_f32.shape == (batch, NUMBER_OF_KEYS)
    assert out_f32.dtype == jnp.float32
    assert jnp.allclose(out_f32, ref, atol=1e-5, rtol=1e-5)

    # default large-batch path (bf16 I/O, f32 accumulate) — looser tolerance
    out_bf16 = jax.block_until_ready(fizzbuzz_forward(x, w1, b1, w2, b2))
    assert out_bf16.shape == (batch, NUMBER_OF_KEYS)
    assert jnp.allclose(out_bf16.astype(jnp.float32), ref, atol=3e-2, rtol=3e-2)

    print("KERNEL_OK")
</pallas_src>

<mosaic_0001>
module attributes {stable_mosaic.version = 11 : i64} {
  func.func @_mlp_kernel(%arg0: i32, %arg1: memref<8x10xf32, #tpu.memory_space<vmem>>, %arg2: memref<10x64xf32, #tpu.memory_space<vmem>>, %arg3: memref<1x64xf32, #tpu.memory_space<vmem>>, %arg4: memref<64x4xf32, #tpu.memory_space<vmem>>, %arg5: memref<1x4xf32, #tpu.memory_space<vmem>>, %arg6: memref<8x4xf32, #tpu.memory_space<vmem>>) attributes {dimension_semantics = [#tpu.dimension_semantics<parallel>], iteration_bounds = array<i64: 1>, scalar_prefetch = 0 : i64, scratch_operands = 0 : i64, tpu.core_type = #tpu.core_type<tc>, window_params = [{transform_indices = @transform_0, window_bounds = array<i64: 8, 10>}, {pipeline_mode = #tpu.pipeline_mode<synchronous>, transform_indices = @transform_1, window_bounds = array<i64: 10, 64>}, {pipeline_mode = #tpu.pipeline_mode<synchronous>, transform_indices = @transform_2, window_bounds = array<i64: 1, 64>}, {pipeline_mode = #tpu.pipeline_mode<synchronous>, transform_indices = @transform_3, window_bounds = array<i64: 64, 4>}, {pipeline_mode = #tpu.pipeline_mode<synchronous>, transform_indices = @transform_4, window_bounds = array<i64: 1, 4>}, {transform_indices = @transform_5, window_bounds = array<i64: 8, 4>}]} {
    %c0 = arith.constant 0 : index
    %c0_0 = arith.constant 0 : index
    %0 = vector.load %arg1[%c0, %c0_0] : memref<8x10xf32, #tpu.memory_space<vmem>>, vector<8x10xf32>
    %c0_1 = arith.constant 0 : index
    %c0_2 = arith.constant 0 : index
    %1 = vector.load %arg2[%c0_1, %c0_2] : memref<10x64xf32, #tpu.memory_space<vmem>>, vector<10x64xf32>
    %cst = arith.constant dense<0.000000e+00> : vector<8x64xf32>
    %2 = tpu.matmul %0, %1, %cst {dimension_numbers = #tpu.dot_dimension_numbers<[1], [0], [0], [1], [0, 0, 1, 1], [], []>} : vector<8x10xf32>, vector<10x64xf32>, vector<8x64xf32> -> vector<8x64xf32>
    %c0_3 = arith.constant 0 : index
    %c0_4 = arith.constant 0 : index
    %3 = vector.load %arg3[%c0_3, %c0_4] : memref<1x64xf32, #tpu.memory_space<vmem>>, vector<1x64xf32>
    %4 = vector.broadcast %3 : vector<1x64xf32> to vector<8x64xf32>
    %5 = arith.addf %2, %4 : vector<8x64xf32>
    %cst_5 = arith.constant 0.000000e+00 : f32
    %6 = vector.broadcast %cst_5 : f32 to vector<8x64xf32>
    %7 = arith.maximumf %5, %6 : vector<8x64xf32>
    %c0_6 = arith.constant 0 : index
    %c0_7 = arith.constant 0 : index
    %8 = vector.load %arg4[%c0_6, %c0_7] : memref<64x4xf32, #tpu.memory_space<vmem>>, vector<64x4xf32>
    %cst_8 = arith.constant dense<0.000000e+00> : vector<8x4xf32>
    %9 = tpu.matmul %7, %8, %cst_8 {dimension_numbers = #tpu.dot_dimension_numbers<[1], [0], [0], [1], [0, 0, 1, 1], [], []>} : vector<8x64xf32>, vector<64x4xf32>, vector<8x4xf32> -> vector<8x4xf32>
    %c0_9 = arith.constant 0 : index
    %c0_10 = arith.constant 0 : index
    %10 = vector.load %arg5[%c0_9, %c0_10] : memref<1x4xf32, #tpu.memory_space<vmem>>, vector<1x4xf32>
    %11 = vector.broadcast %10 : vector<1x4xf32> to vector<8x4xf32>
    %12 = arith.addf %9, %11 : vector<8x4xf32>
    %c0_11 = arith.constant 0 : index
    %c0_12 = arith.constant 0 : index
    %13 = vector.load %arg6[%c0_11, %c0_12] : memref<8x4xf32, #tpu.memory_space<vmem>>, vector<8x4xf32>
    tpu.vector_store %arg6[%c0_11, %c0_12], %12 {strides = array<i32>} : memref<8x4xf32, #tpu.memory_space<vmem>>, vector<8x4xf32>,
    return
  }
  func.func @transform_0(%arg0: i32) -> (i32, i32) {
    %c0_i32 = arith.constant 0 : i32
    %c0_i32_0 = arith.constant 0 : i32
    return %arg0, %c0_i32 : i32, i32
  }
  func.func @transform_1(%arg0: i32) -> (i32, i32) {
    %c0_i32 = arith.constant 0 : i32
    %c0_i32_0 = arith.constant 0 : i32
    %c0_i32_1 = arith.constant 0 : i32
    return %c0_i32, %c0_i32_0 : i32, i32
  }
  func.func @transform_2(%arg0: i32) -> (i32, i32) {
    %c0_i32 = arith.constant 0 : i32
    %c0_i32_0 = arith.constant 0 : i32
    %c0_i32_1 = arith.constant 0 : i32
    return %c0_i32, %c0_i32_0 : i32, i32
  }
  func.func @transform_3(%arg0: i32) -> (i32, i32) {
    %c0_i32 = arith.constant 0 : i32
    %c0_i32_0 = arith.constant 0 : i32
    %c0_i32_1 = arith.constant 0 : i32
    return %c0_i32, %c0_i32_0 : i32, i32
  }
  func.func @transform_4(%arg0: i32) -> (i32, i32) {
    %c0_i32 = arith.constant 0 : i32
    %c0_i32_0 = arith.constant 0 : i32
    %c0_i32_1 = arith.constant 0 : i32
    return %c0_i32, %c0_i32_0 : i32, i32
  }
  func.func @transform_5(%arg0: i32) -> (i32, i32) {
    %c0_i32 = arith.constant 0 : i32
    %c0_i32_0 = arith.constant 0 : i32
    return %arg0, %c0_i32 : i32, i32
  }
}

</mosaic_0001>

<bundles_post_ra>
// kernel: tpu_custom_call.1
= control target key start
LH: loop header
LB: loop body
LE: loop exit
PB: predicated region body
PF: predicated region fallthrough
CT: control target
= control target key end

     0   :  { %vm34_vm0 = vcmask 1041408   ;;  %v249_v0 = vmov 0.0   ;;  %vm250_vm1 = vmmov 0   ;;  %vm30_vm2 = vcmask 80896   ;;  %s325_s1 = inlined_call_operand.vmem [shape: f32[10,64], index: 1, kind: input, shape index: {}]   ;;  %s326_s0 = inlined_call_operand.vmem [shape: f32[8,10], index: 0, kind: input, shape index: {}]   ;;  %s327_s3 = inlined_call_operand.vmem [shape: f32[64,4], index: 3, kind: input, shape index: {}]   ;;  %s328_s2 = inlined_call_operand.vmem [shape: f32[1,64], index: 2, kind: input, shape index: {}]   ;;  %s329_s4 = inlined_call_operand.vmem [shape: f32[1,4], index: 4, kind: input, shape index: {}]   ;;  %s330_s5 = inlined_call_operand.vmem [shape: f32[8,4], index: 5, kind: output, shape index: {}]  }
   0x1   :  { %221 = vmatprep.subr.mxu0 %v249_v0  ;;  %v22_v1 = vld [vmem:[%s325_s1 + $0x8] sm:$0x3]  ;;  %v21_v2 = vld [vmem:[%s325_s1] sm:$0xff]  ;;  %225 = vmatprep.mubr.msk.f32.mxu0 %vm250_vm1, %v249_v0  ;;  %v116_v4 = vld [vmem:[%s327_s3 + $0x38] sm:$0xff]  ;;  %vm124_vm3 = vcmask 523264   ;;  %vm198_vm4 = vcmask 31744  }
   0x2   :  { %222 = vmatpush3.msk.msra.mxu0 %vm34_vm0, %v22_v1  ;;  %v20_v3 = vld [vmem:[%s326_s0] sm:$0xff]  ;;  %228 = vmatprep.subr.mxu1 %v249_v0  ;;  %v115_v5 = vld [vmem:[%s327_s3 + $0x30] sm:$0xff]  ;;  %v114_v6 = vld [vmem:[%s327_s3 + $0x28] sm:$0xff] }
   0x3   :  { %223 = vmatprep.subr.mxu0 %v249_v0  ;;  %229 = vmatpush3.msra.mxu1 %v116_v4  ;;  %v113_v7 = vld [vmem:[%s327_s3 + $0x20] sm:$0xff]  ;;  %v112_v8 = vld [vmem:[%s327_s3 + $0x18] sm:$0xff]  ;;  %v111_v9 = vld [vmem:[%s327_s3 + $0x10] sm:$0xff] }
   0x4   :  { %224 = vmatpush3.msra.mxu0 %v21_v2  ;;  %230 = vmatprep.subr.mxu1 %v249_v0  ;;  %v110_v10 = vld [vmem:[%s327_s3 + $0x8] sm:$0xff]  ;;  %v109_v11 = vld [vmem:[%s327_s3] sm:$0xff] }
   0x5   :  { %226 = vmatmul.mubr.msk.f32.vlgmr.msra.gmra.mxu0 %vm30_vm2, %v20_v3  ;;  %231 = vmatpush3.msra.mxu1 %v115_v5  ;;  %v204_v12 = vld [vmem:[%s328_s2] ss:$0 sm:$0xff] }
   0x6   :  { %232 = vmatprep.subr.mxu1 %v249_v0  ;;  %244 = vmatprep.mubr.msk.f32.mxu1 %vm250_vm1, %v249_v0  ;;  %v207_v17 = vld [vmem:[%s329_s4] ss:$0 sm:$0xff] }
   0x7   :  { %233 = vmatpush3.msra.mxu1 %v114_v6 }
   0x8   :  { %234 = vmatprep.subr.mxu1 %v249_v0 }
   0x9   :  { %235 = vmatpush3.msra.mxu1 %v113_v7 }
   0xa   :  { %236 = vmatprep.subr.mxu1 %v249_v0 }
   0xb   :  { %237 = vmatpush3.msra.mxu1 %v112_v8 }
   0xc   :  { %238 = vmatprep.subr.mxu1 %v249_v0 }
   0xd   :  { %239 = vmatpush3.msra.mxu1 %v111_v9 }
   0xe   :  { %240 = vmatprep.subr.mxu1 %v249_v0 }
   0xf   :  { %241 = vmatpush3.msra.mxu1 %v110_v10 }
  0x10   :  { %242 = vmatprep.subr.mxu1 %v249_v0 }
  0x11   :  { %243 = vmatpush3.msra.mxu1 %v109_v11 }
  0xc5   :  { %v104_v13 = vpop.f32.mrf.mxu0 }
  0xc6   :  { %v105_v14 = vadd.f32 %v204_v12, %v104_v13 }
  0xc7   :  { %v227_v15 = vpop.f32.mrf.mxu0 }
  0xc8   :  { %v108_v16 = vmax.f32 %v105_v14, 0.0 }
  0xca   :  { %245 = vmatmul.mubr.msk.f32.vlgmr.msra.gmra.mxu1 %vm124_vm3, %v108_v16 }
 0x18a   :  { %v194_v18 = vpop.f32.mrf.mxu1 }
 0x18b   :  { %v195_v19 = vadd.f32 %v207_v17, %v194_v18 }
 0x18c   :  { %v246_v20 = vpop.f32.mrf.mxu1 }
 0x18d   :  { %199 = vst.msk [vmem:[%s330_s5] sm:$0xff] %vm198_vm4, %v195_v19 }

</bundles_post_ra>
